<compile_context>
chip_gen: v6e
topology: v6e:2x2x1
jax: 0.10.0
libtpu: 0.0.40
codegen_flags: <defaults>
</compile_context>

<pallas_src>
import functools

import jax
import jax.numpy as jnp
from jax import lax
from jax.experimental import pallas as pl
from jax.experimental.pallas import tpu as pltpu


def _focal_loss_kernel(x_ref, t_ref, o_ref, *, gamma, n_cls, s_rows, r_rows,
                       hw, needs_mask):
    # x_ref: (1, C, S, 128) logits tile   (spatial dense over sublanes+lanes)
    # t_ref: (1, S, 128)    int32 targets
    # o_ref: (1, 1, R, 128) per-(batch, spatial-tile) partial loss sums
    j = pl.program_id(1)
    t = t_ref[0]                                        # (S, 128)

    # Pass 1: running max over classes (dense VPU maxes on (S,128) slabs).
    m = x_ref[0, 0].astype(jnp.float32)
    for c in range(1, n_cls):
        m = jnp.maximum(m, x_ref[0, c].astype(jnp.float32))

    # Pass 2: one exp per class; gather z and exp(z) at the target class with
    # (t == c) selects (kept on the VPU — no one-hot MXU matmul).
    zero = jnp.zeros_like(m)
    sumexp = zero
    z_t = zero
    ez_t = zero
    for c in range(n_cls):
        z_c = x_ref[0, c].astype(jnp.float32) - m
        ez_c = jnp.exp(z_c)
        sumexp = sumexp + ez_c
        sel = t == c
        z_t = jnp.where(sel, z_c, z_t)
        ez_t = jnp.where(sel, ez_c, ez_t)
    # NOTE: out-of-range labels (e.g. ignore_index=255/-100) are not
    # supported, matching the reference gather semantics.

    logpt = z_t - jnp.log(sumexp)                       # (S, 128)
    pt = ez_t * pl.reciprocal(sumexp, approx=True)      # avoids a 2nd exp
    one_m_pt = 1.0 - pt
    if gamma == 2.0:
        focal = one_m_pt * one_m_pt                     # plain VPU muls
    elif float(gamma).is_integer() and gamma >= 0:
        focal = lax.integer_pow(one_m_pt, int(gamma))
    else:
        focal = one_m_pt ** gamma
    loss = -focal * logpt                               # (S, 128)
    # TODO(synk): alpha-weighting (alpha gathered at target) omitted — module
    # default is alpha=None; it would be one extra (t == c) select per class.

    def _reduce_and_store(l):
        if r_rows == s_rows:
            o_ref[0, 0, :, :] = l
        else:                                           # s_rows % 8 == 0
            acc = l[0:8]
            for g in range(1, s_rows // 8):
                acc = acc + l[g * 8:(g + 1) * 8]
            o_ref[0, 0, :, :] = acc

    if needs_mask:
        last = pl.num_programs(1) - 1

        @pl.when(j == last)
        def _():
            # Iota + mask only materialized on the tail tile.
            row = j * s_rows + lax.broadcasted_iota(jnp.int32, loss.shape, 0)
            col = lax.broadcasted_iota(jnp.int32, loss.shape, 1)
            pos = row * 128 + col
            # Select (not multiply) so NaN/Inf from out-of-bounds lanes
            # cannot propagate into the partial sum.
            _reduce_and_store(jnp.where(pos < hw, loss, 0.0))

        @pl.when(j != last)
        def _():
            _reduce_and_store(loss)
    else:
        _reduce_and_store(loss)


def focal_loss(logits_nchw, target_nhw, *, gamma=2.0, size_average=True):
    """Focal loss (alpha=None) matching FocalLoss.forward on NCHW logits."""
    B, C, H, W = logits_nchw.shape
    hw = H * W

    # Free trailing-dim reshapes: (B, C, hw) and (B, hw); no transpose.
    x = logits_nchw.reshape(B, C, hw)
    t = target_nhw.reshape(B, hw).astype(jnp.int32)

    # Common case hw % 128 == 0: split hw into (rows, 128) so positions fill
    # sublanes AND lanes.  Uncommon fallback: one pad pass, masked in-kernel.
    hw_pad = pl.cdiv(hw, 128) * 128
    if hw_pad != hw:
        x = jnp.pad(x, ((0, 0), (0, 0), (0, hw_pad - hw)))
        t = jnp.pad(t, ((0, 0), (0, hw_pad - hw)))
    n_rows = hw_pad // 128
    x4 = x.reshape(B, C, n_rows, 128)
    t4 = t.reshape(B, n_rows, 128)

    # Spatial tile: at most 64 rows x 128 lanes = 8192 positions per step.
    s_rows = n_rows if n_rows <= 64 else 64
    grid_hw = pl.cdiv(n_rows, s_rows)
    # Per-tile partial rows: fold sublane groups down to 8 when possible so
    # output HBM traffic stays ~4 KiB/step.
    r_rows = 8 if s_rows % 8 == 0 else s_rows
    needs_mask = (grid_hw * s_rows * 128) != hw

    kernel = functools.partial(
        _focal_loss_kernel, gamma=gamma, n_cls=C, s_rows=s_rows,
        r_rows=r_rows, hw=hw, needs_mask=needs_mask)

    partials = pl.pallas_call(
        kernel,
        out_shape=jax.ShapeDtypeStruct((B, grid_hw, r_rows, 128), jnp.float32),
        grid_spec=pltpu.PrefetchScalarGridSpec(
            num_scalar_prefetch=0,
            grid=(B, grid_hw),
            in_specs=[
                pl.BlockSpec((1, C, s_rows, 128), lambda b, j: (b, 0, j, 0)),
                pl.BlockSpec((1, s_rows, 128), lambda b, j: (b, j, 0)),
            ],
            out_specs=pl.BlockSpec((1, 1, r_rows, 128),
                                   lambda b, j: (b, j, 0, 0)),
        ),
        compiler_params=pltpu.CompilerParams(
            # Every (b, j) tile writes its own partial block, so both grid
            # axes are independent -> schedulable across v7x's 2 TensorCores.
            dimension_semantics=("parallel", "parallel"),
            # Explicit but modest: blocks + temps use well under 2 MiB.
            vmem_limit_bytes=16 * 1024 * 1024,
        ),
    )(x4, t4)

    total = jnp.sum(partials)
    if size_average:
        total = total / jnp.float32(B * hw)
    return total


def _focal_loss_ref(logits_nchw, target_nhw, gamma=2.0):
    B, C, H, W = logits_nchw.shape
    x = jnp.transpose(logits_nchw, (0, 2, 3, 1)).reshape(-1, C)
    t = target_nhw.reshape(-1)
    logp = jax.nn.log_softmax(x, axis=-1)
    logpt = jnp.take_along_axis(logp, t[:, None], axis=1)[:, 0]
    pt = jnp.exp(logpt)
    return jnp.mean(-((1.0 - pt) ** gamma) * logpt)


if __name__ == "__main__":
    key = jax.random.PRNGKey(0)
    k1, k2 = jax.random.split(key)
    B, C, H, W = 2, 4, 16, 16
    logits = jax.random.normal(k1, (B, C, H, W), dtype=jnp.float32)
    target = jax.random.randint(k2, (B, H, W), 0, C, dtype=jnp.int32)

    loss = jax.block_until_ready(focal_loss(logits, target, gamma=2.0))
    ref = jax.block_until_ready(_focal_loss_ref(logits, target, gamma=2.0))

    # The only deviation vs. the exact reference is the approximate EUP
    # reciprocal used for pt (per perf feedback); its relative error is far
    # below this tolerance.
    assert jnp.allclose(loss, ref, atol=1e-3, rtol=1e-3), (loss, ref)
    print("KERNEL_OK")
</pallas_src>

<mosaic_0001>
module attributes {stable_mosaic.version = 11 : i64} {
  func.func @_focal_loss_kernel(%arg0: i32, %arg1: i32, %arg2: memref<1x4x2x128xf32, #tpu.memory_space<vmem>>, %arg3: memref<1x2x128xi32, #tpu.memory_space<vmem>>, %arg4: memref<1x1x2x128xf32, #tpu.memory_space<vmem>>) attributes {dimension_semantics = [#tpu.dimension_semantics<parallel>, #tpu.dimension_semantics<parallel>], iteration_bounds = array<i64: 2, 1>, scalar_prefetch = 0 : i64, scratch_operands = 0 : i64, tpu.core_type = #tpu.core_type<tc>, window_params = [{transform_indices = @transform_0, window_bounds = array<i64: 1, 4, 2, 128>}, {transform_indices = @transform_1, window_bounds = array<i64: 1, 2, 128>}, {transform_indices = @transform_2, window_bounds = array<i64: 1, 1, 2, 128>}]} {
    %c0 = arith.constant 0 : index
    %c0_0 = arith.constant 0 : index
    %c0_1 = arith.constant 0 : index
    %0 = vector.load %arg3[%c0, %c0_0, %c0_1] : memref<1x2x128xi32, #tpu.memory_space<vmem>>, vector<1x2x128xi32>
    %1 = vector.shape_cast %0 : vector<1x2x128xi32> to vector<2x128xi32>
    %c0_2 = arith.constant 0 : index
    %c0_3 = arith.constant 0 : index
    %c0_4 = arith.constant 0 : index
    %c0_5 = arith.constant 0 : index
    %2 = vector.load %arg2[%c0_2, %c0_3, %c0_4, %c0_5] : memref<1x4x2x128xf32, #tpu.memory_space<vmem>>, vector<1x1x2x128xf32>
    %3 = vector.shape_cast %2 : vector<1x1x2x128xf32> to vector<2x128xf32>
    %c0_6 = arith.constant 0 : index
    %c1 = arith.constant 1 : index
    %c0_7 = arith.constant 0 : index
    %c0_8 = arith.constant 0 : index
    %4 = vector.load %arg2[%c0_6, %c1, %c0_7, %c0_8] : memref<1x4x2x128xf32, #tpu.memory_space<vmem>>, vector<1x1x2x128xf32>
    %5 = vector.shape_cast %4 : vector<1x1x2x128xf32> to vector<2x128xf32>
    %6 = arith.maximumf %3, %5 : vector<2x128xf32>
    %c0_9 = arith.constant 0 : index
    %c2 = arith.constant 2 : index
    %c0_10 = arith.constant 0 : index
    %c0_11 = arith.constant 0 : index
    %7 = vector.load %arg2[%c0_9, %c2, %c0_10, %c0_11] : memref<1x4x2x128xf32, #tpu.memory_space<vmem>>, vector<1x1x2x128xf32>
    %8 = vector.shape_cast %7 : vector<1x1x2x128xf32> to vector<2x128xf32>
    %9 = arith.maximumf %6, %8 : vector<2x128xf32>
    %c0_12 = arith.constant 0 : index
    %c3 = arith.constant 3 : index
    %c0_13 = arith.constant 0 : index
    %c0_14 = arith.constant 0 : index
    %10 = vector.load %arg2[%c0_12, %c3, %c0_13, %c0_14] : memref<1x4x2x128xf32, #tpu.memory_space<vmem>>, vector<1x1x2x128xf32>
    %11 = vector.shape_cast %10 : vector<1x1x2x128xf32> to vector<2x128xf32>
    %12 = arith.maximumf %9, %11 : vector<2x128xf32>
    %cst = arith.constant 0.000000e+00 : f32
    %13 = vector.broadcast %cst : f32 to vector<2x128xf32>
    %c0_15 = arith.constant 0 : index
    %c0_16 = arith.constant 0 : index
    %c0_17 = arith.constant 0 : index
    %c0_18 = arith.constant 0 : index
    %14 = vector.load %arg2[%c0_15, %c0_16, %c0_17, %c0_18] : memref<1x4x2x128xf32, #tpu.memory_space<vmem>>, vector<1x1x2x128xf32>
    %15 = vector.shape_cast %14 : vector<1x1x2x128xf32> to vector<2x128xf32>
    %16 = arith.subf %15, %12 : vector<2x128xf32>
    %17 = math.exp %16 : vector<2x128xf32>
    %18 = arith.addf %13, %17 : vector<2x128xf32>
    %c0_i32 = arith.constant 0 : i32
    %19 = vector.broadcast %c0_i32 : i32 to vector<2x128xi32>
    %20 = arith.cmpi eq, %1, %19 : vector<2x128xi32>
    %21 = arith.select %20, %16, %13 : vector<2x128xi1>, vector<2x128xf32>
    %22 = arith.select %20, %17, %13 : vector<2x128xi1>, vector<2x128xf32>
    %c0_19 = arith.constant 0 : index
    %c1_20 = arith.constant 1 : index
    %c0_21 = arith.constant 0 : index
    %c0_22 = arith.constant 0 : index
    %23 = vector.load %arg2[%c0_19, %c1_20, %c0_21, %c0_22] : memref<1x4x2x128xf32, #tpu.memory_space<vmem>>, vector<1x1x2x128xf32>
    %24 = vector.shape_cast %23 : vector<1x1x2x128xf32> to vector<2x128xf32>
    %25 = arith.subf %24, %12 : vector<2x128xf32>
    %26 = math.exp %25 : vector<2x128xf32>
    %27 = arith.addf %18, %26 : vector<2x128xf32>
    %c1_i32 = arith.constant 1 : i32
    %28 = vector.broadcast %c1_i32 : i32 to vector<2x128xi32>
    %29 = arith.cmpi eq, %1, %28 : vector<2x128xi32>
    %30 = arith.select %29, %25, %21 : vector<2x128xi1>, vector<2x128xf32>
    %31 = arith.select %29, %26, %22 : vector<2x128xi1>, vector<2x128xf32>
    %c0_23 = arith.constant 0 : index
    %c2_24 = arith.constant 2 : index
    %c0_25 = arith.constant 0 : index
    %c0_26 = arith.constant 0 : index
    %32 = vector.load %arg2[%c0_23, %c2_24, %c0_25, %c0_26] : memref<1x4x2x128xf32, #tpu.memory_space<vmem>>, vector<1x1x2x128xf32>
    %33 = vector.shape_cast %32 : vector<1x1x2x128xf32> to vector<2x128xf32>
    %34 = arith.subf %33, %12 : vector<2x128xf32>
    %35 = math.exp %34 : vector<2x128xf32>
    %36 = arith.addf %27, %35 : vector<2x128xf32>
    %c2_i32 = arith.constant 2 : i32
    %37 = vector.broadcast %c2_i32 : i32 to vector<2x128xi32>
    %38 = arith.cmpi eq, %1, %37 : vector<2x128xi32>
    %39 = arith.select %38, %34, %30 : vector<2x128xi1>, vector<2x128xf32>
    %40 = arith.select %38, %35, %31 : vector<2x128xi1>, vector<2x128xf32>
    %c0_27 = arith.constant 0 : index
    %c3_28 = arith.constant 3 : index
    %c0_29 = arith.constant 0 : index
    %c0_30 = arith.constant 0 : index
    %41 = vector.load %arg2[%c0_27, %c3_28, %c0_29, %c0_30] : memref<1x4x2x128xf32, #tpu.memory_space<vmem>>, vector<1x1x2x128xf32>
    %42 = vector.shape_cast %41 : vector<1x1x2x128xf32> to vector<2x128xf32>
    %43 = arith.subf %42, %12 : vector<2x128xf32>
    %44 = math.exp %43 : vector<2x128xf32>
    %45 = arith.addf %36, %44 : vector<2x128xf32>
    %c3_i32 = arith.constant 3 : i32
    %46 = vector.broadcast %c3_i32 : i32 to vector<2x128xi32>
    %47 = arith.cmpi eq, %1, %46 : vector<2x128xi32>
    %48 = arith.select %47, %43, %39 : vector<2x128xi1>, vector<2x128xf32>
    %49 = arith.select %47, %44, %40 : vector<2x128xi1>, vector<2x128xf32>
    %50 = math.log %45 : vector<2x128xf32>
    %51 = arith.subf %48, %50 : vector<2x128xf32>
    %52 = tpu.reciprocal %45 {approx = true} : vector<2x128xf32> -> vector<2x128xf32>
    %53 = arith.mulf %49, %52 : vector<2x128xf32>
    %cst_31 = arith.constant 1.000000e+00 : f32
    %54 = vector.broadcast %cst_31 : f32 to vector<2x128xf32>
    %55 = arith.subf %54, %53 : vector<2x128xf32>
    %56 = arith.mulf %55, %55 : vector<2x128xf32>
    %cst_32 = arith.constant 0.000000e+00 : f32
    %57 = vector.broadcast %cst_32 : f32 to vector<2x128xf32>
    %58 = arith.subf %57, %56 : vector<2x128xf32>
    %59 = arith.mulf %58, %51 : vector<2x128xf32>
    %c0_33 = arith.constant 0 : index
    %c0_34 = arith.constant 0 : index
    %c0_35 = arith.constant 0 : index
    %c0_36 = arith.constant 0 : index
    %60 = vector.load %arg4[%c0_33, %c0_34, %c0_35, %c0_36] : memref<1x1x2x128xf32, #tpu.memory_space<vmem>>, vector<1x1x2x128xf32>
    %61 = vector.shape_cast %60 : vector<1x1x2x128xf32> to vector<2x128xf32>
    %62 = vector.shape_cast %59 : vector<2x128xf32> to vector<1x1x2x128xf32>
    tpu.vector_store %arg4[%c0_33, %c0_34, %c0_35, %c0_36], %62 {strides = array<i32>} : memref<1x1x2x128xf32, #tpu.memory_space<vmem>>, vector<1x1x2x128xf32>,
    return
  }
  func.func @transform_0(%arg0: i32, %arg1: i32) -> (i32, i32, i32, i32) {
    %c0_i32 = arith.constant 0 : i32
    %c0_i32_0 = arith.constant 0 : i32
    %c0_i32_1 = arith.constant 0 : i32
    return %arg0, %c0_i32, %arg1, %c0_i32_0 : i32, i32, i32, i32
  }
  func.func @transform_1(%arg0: i32, %arg1: i32) -> (i32, i32, i32) {
    %c0_i32 = arith.constant 0 : i32
    %c0_i32_0 = arith.constant 0 : i32
    return %arg0, %arg1, %c0_i32 : i32, i32, i32
  }
  func.func @transform_2(%arg0: i32, %arg1: i32) -> (i32, i32, i32, i32) {
    %c0_i32 = arith.constant 0 : i32
    %c0_i32_0 = arith.constant 0 : i32
    %c0_i32_1 = arith.constant 0 : i32
    return %arg0, %arg1, %c0_i32, %c0_i32_0 : i32, i32, i32, i32
  }
}

</mosaic_0001>

<bundles_post_ra>
// kernel: tpu_custom_call.1
= control target key start
LH: loop header
LB: loop body
LE: loop exit
PB: predicated region body
PF: predicated region fallthrough
CT: control target
= control target key end

     0   :  { %7 = vsyncpa [#allocation3], 0  ;;  %s818_s0 = inlined_call_operand.hbm [shape: f32[2,4,2,128], index: 0, kind: input, shape index: {}]   ;;  %s819_s1 = inlined_call_operand.hbm [shape: s32[2,2,128], index: 1, kind: input, shape index: {}]   ;;  %s820_s2 = inlined_call_operand.hbm [shape: f32[2,1,2,128], index: 2, kind: output, shape index: {}]  }
   0x1   :  { %9 = vsyncpa [#allocation3 + $0x1], 0 }
   0x2   :  { %10 = vsyncpa [#allocation6], 0 }
   0x3   :  { %12 = vsyncpa [#allocation6 + $0x1], 0 }
   0x4   :  { %13 = vsyncpa [#allocation4], 0 }
   0x5   :  { %15 = vsyncpa [#allocation4 + $0x1], 0  ;;  %s652_s9 = smov 0   ;;  %s654_s10 = smov 0  }
   0x6   :  { %s656_s11 = smov 0   ;;  %s658_s12 = smov 0  }
   0x7   :  { %s660_s13 = smov 0   ;;  %s662_s14 = smov 0  }
   0x8 LB: > { %s388_s15 = sadd.s32 4294967295, %s630_s14   ;;  %s389_s16 = sadd.s32 4294967294, %s630_s14   ;;  %s630_s14 = sphi %s662_s14, %s21_s14   ;;  %s626_s13 = sphi %s660_s13, %s832_s13   ;;  %s622_s12 = sphi %s658_s12, %s831_s12   ;;  %s618_s11 = sphi %s656_s11, %s830_s11   ;;  %s614_s10 = sphi %s654_s10, %s829_s10   ;;  %s610_s9 = sphi %s652_s9, %s828_s9  }
   0x9   : > { %s33_s17 = sadd.s32 1, %s626_s13  ;;  %s42_s18 = sadd.s32 1, %s618_s11 }
   0xa   : > { %p35_p0 = scmp.ge.s32.totalorder %s33_s17, 2  ;;  %p49_p1 = scmp.ne.s32.totalorder %s618_s11, %s614_s10 }
   0xb   : > { %p50_p2 = scmp.eq.s32.totalorder %s630_s14, 0  ;;  %p55_p3 = scmp.ne.s32.totalorder %s614_s10, %s610_s9 }
   0xc   : > { %s834_s17 = smov (%p35_p0, %s33_s17), 0  ;;  %p56_p5 = scmp.eq.s32.totalorder %s388_s15, 0 }
   0xd   : > { %p693_p4 = por %p50_p2, %p49_p1  ;;  %s37_s20 = ssub.s32 %s626_s13, %s834_s17 }
   0xe   : > { %p109_p6 = scmp.eq.s32.totalorder %s388_s15, 1  ;;  %p40_p7 = scmp.eq.s32.totalorder %s37_s20, 0 }
   0xf   : > { %p699_p8 = por %p56_p5, %p55_p3  ;;  %p115_p10 = scmp.eq.s32.totalorder %s389_s16, 1 }
  0x10   : > { %p703_p9 = por %p109_p6, %p49_p1  ;;  %p426_p13 = scmp.lt.s32.totalorder %s630_s14, 2 }
  0x11   : > { %s708_s23 = scalar_select %p40_p7, %s618_s11, %s42_s18  }
  0x12   : > { %p710_p11 = por %p115_p10, %p55_p3  ;;  %s717_s25 = sand.u32 1, %s618_s11  }
  0x13   : > { %s392_s26 = sshll.u32 %s717_s25, 3  ;;  %s408_s27 = sshll.u32 %s626_s13, 7 }
  0x14   : > { %s146_s30 = scalar_lea.hbm %s818_s0, %s408_s27  ;;  %s139_s3 = scalar_lea.vmem [#allocation2], %s392_s26 }
  0x15   : > { %s147_s4 = sshll.u32 %s139_s3, 4  ;;  %p726_p0 = pnand %p426_p13, %p693_p4  ;;  %s148_s4 = int_to_ptr.vmem [resolvable:$true] %s147_s4 }
  0x16   : > { %p397_p1 = scmp.ge.s32.totalorder %s630_s14, 1  ;;  %s136_s6 = scalar_lea.sflag [#allocation3], %s717_s25 }
  0x17   : > { %p492_p2 = pneg %p726_p0  ;;  %s503_s7 = scalar_lea.vmem %s148_s4, 128 }
  0x18   : > { %p504_p3 = scmp.ne.s32.totalorder %s148_s4, %s503_s7  ;;  %s632_s8 = smov [#allocation2]  }
  0x19   : > { %s508_s15 = sshll.u32 %s632_s8, 4  ;;  %s509_s15 = int_to_ptr.vmem [resolvable:$false] %s508_s15 }
  0x1a   : > { %p506_p5 = pnand %p504_p3, %p492_p2  ;;  %s510_s16 = scalar_lea.vmem %s509_s15, 256 }
  0x1b   : > { %p511_p4 = scmp.lt.s32.totalorder %s148_s4, %s509_s15  ;;  %p512_p7 = scmp.lt.s32.totalorder %s510_s16, %s503_s7 }
  0x1c   : > { %p507_p6 = pneg %p506_p5 }
  0x1d   : > { %p513_p10 = por %p512_p7, %p511_p4 }
  0x1f   : > { %p514_p13 = pnand %p513_p10, %p507_p6 }
  0x21   : > { %517 = shalt.err (!%p514_p13)
}
  0x22   : > { %s633_s18 = smov 32   ;;  %s634_s19 = smov 2  }
  0x23   : > { %418 = dma.hbm_to_vmem [thread:$0]  (!%p726_p0), %s146_s30, 128, %s148_s4, %s136_s6, %s633_s18, %s633_s18, %s634_s19  }
  0x24   : > { %p174_p3 = scmp.lt.s32.totalorder %s630_s14, 3  ;;  %s395_s20 = sshll.u32 %s717_s25, 1 }
  0x25   : > { %s396_s26 = sshll.u32 %s626_s13, 5  ;;  %s161_s7 = scalar_lea.vmem [#allocation5], %s395_s20 }
  0x26   : > { %p744_p5 = pnand %p397_p1, %p174_p3  ;;  %s167_s3 = scalar_lea.hbm %s819_s1, %s396_s26 }
  0x27   : > { %s169_s8 = sshll.u32 %s161_s7, 4  ;;  %s158_s15 = scalar_lea.sflag [#allocation6], %s717_s25  ;;  %s170_s8 = int_to_ptr.vmem [resolvable:$true] %s169_s8 }
  0x28   : > { %s531_s16 = scalar_lea.vmem %s170_s8, 32  ;;  %s635_s30 = smov [#allocation5]  }
  0x29   : > { %p532_p6 = scmp.ne.s32.totalorder %s170_s8, %s531_s16  ;;  %s536_s4 = sshll.u32 %s635_s30, 4  ;;  %s537_s4 = int_to_ptr.vmem [resolvable:$false] %s536_s4 }
  0x2a   : > { %s538_s6 = scalar_lea.vmem %s537_s4, 64  ;;  %p539_p1 = scmp.lt.s32.totalorder %s170_s8, %s537_s4 }
  0x2b   : > { %p534_p4 = pnand %p532_p6, %p492_p2  ;;  %p540_p10 = scmp.lt.s32.totalorder %s538_s6, %s531_s16 }
  0x2d   : > { %p535_p7 = pneg %p534_p4  ;;  %p541_p13 = por %p540_p10, %p539_p1 }
  0x2f   : > { %p542_p3 = pnand %p541_p13, %p535_p7 }
  0x31   : > { %545 = shalt.err (!%p542_p3)
}
  0x32   : > { %421 = dma.hbm_to_vmem [thread:$0]  (!%p726_p0), %s167_s3, 32, %s170_s8, %s158_s15  }
  0x33   : > { %178 = sbr.rel (%p744_p5) target bundleno = 130 (0x82), region = 28  ;;  %s760_s25 = sand.u32 (!%p744_p5), 1, %s614_s10  }
  0x34   : > { %s398_s18 = sshll.u32 (!%p744_p5), %s760_s25, 3  ;;  %s181_s19 = scalar_lea.sflag (!%p744_p5), [#allocation3], %s760_s25 }
  0x35   : > { %s184_s20 = scalar_lea.vmem (!%p744_p5), [#allocation2], %s398_s18 }
  0x38   : > { %597 = dma.done.wait (%p699_p8), %s181_s19, 128  }
  0x39   : > { %599 = vsyncadd (%p699_p8), %s181_s19, 4294967168  ;;  %s399_s5 = sshll.u32 %s760_s25, 1  ;;  %s190_s26 = scalar_lea.sflag [#allocation6], %s760_s25 }
  0x3a   : > { %s193_s27 = scalar_lea.vmem [#allocation5], %s399_s5 }
  0x3b   : > { %601 = dma.done.wait (%p699_p8), %s190_s26, 32  }
  0x3c   : > { %603 = vsyncadd (%p699_p8), %s190_s26, 4294967264  ;;  %v220_v0 = vld [vmem:[%s184_s20] sm:$0x3]  ;;  %v401_v1 = vld [vmem:[%s184_s20 + $0x2] sm:$0x3]  ;;  %s218_s21 = scalar_lea.vmem [#allocation7], %s399_s5 }
  0x3d   : > { %v223_v2 = vmax.f32 %v220_v0, %v401_v1  ;;  %v402_v3 = vld [vmem:[%s184_s20 + $0x4] sm:$0x3]  ;;  %v403_v4 = vld [vmem:[%s184_s20 + $0x6] sm:$0x3]  ;;  %v219_v21 = vld [vmem:[%s193_s27] sm:$0x3] }
  0x3e   : > { %vm234_vm0 = vcmp.eq.s32.totalorder %v219_v21, 0  ;;  %vm241_vm1 = vcmp.eq.s32.totalorder %v219_v21, 1  ;;  %vm248_vm2 = vcmp.eq.s32.totalorder %v219_v21, 2  ;;  %vm255_vm3 = vcmp.eq.s32.totalorder %v219_v21, 3  ;;  %s283_s28 = sshll.u32 %s218_s21, 4  ;;  %s405_s29 = sshll.u32 %s622_s12, 5  ;;  %s284_s28 = int_to_ptr.vmem [resolvable:$true] %s283_s28 }
  0x3f   : > { %v226_v5 = vmax.f32 %v223_v2, %v402_v3  ;;  %s281_s8 = scalar_lea.hbm %s820_s2, %s405_s29  ;;  %s269_s15 = scalar_lea.sflag [#allocation4], %s760_s25 }
  0x40   : > { %s546_s16 = scalar_lea.vmem %s284_s28, 32  ;;  %s636_s30 = smov [#allocation7]  }
  0x41   : > { %v229_v6 = vmax.f32 %v226_v5, %v403_v4  ;;  %p547_p8 = scmp.ne.s32.totalorder %s284_s28, %s546_s16  ;;  %s550_s4 = sshll.u32 %s636_s30, 4  ;;  %s551_s4 = int_to_ptr.vmem [resolvable:$false] %s550_s4 }
  0x42   : > { %s552_s6 = scalar_lea.vmem %s551_s4, 64  ;;  %p553_p5 = scmp.lt.s32.totalorder %s284_s28, %s551_s4 }
  0x43   : > { %v230_v7 = vsub.f32 %v220_v0, %v229_v6  ;;  %v237_v8 = vsub.f32 %v401_v1, %v229_v6  ;;  %v244_v9 = vsub.f32 %v402_v3, %v229_v6  ;;  %v251_v10 = vsub.f32 %v403_v4, %v229_v6  ;;  %p548_p0 = pnand %p547_p8, %p703_p9  ;;  %p554_p6 = scmp.lt.s32.totalorder %s552_s6, %s546_s16 }
  0x45   : > { %v231_v11 = vmul.f32 1.442695, %v230_v7  ;;  %v238_v12 = vmul.f32 1.442695, %v237_v8  ;;  %v245_v13 = vmul.f32 1.442695, %v244_v9  ;;  %p549_p2 = pneg %p548_p0  ;;  %p555_p4 = por %p554_p6, %p553_p5 }
  0x46   : > { %v252_v14 = vmul.f32 1.442695, %v251_v10  ;;  %v235_v25 = vsel %vm234_vm0, %v230_v7, 0.0 }
  0x47   : > { %478 = vpow2.f32 %v231_v11  ;;  %v242_v27 = vsel %vm241_vm1, %v237_v8, %v235_v25  ;;  %p556_p7 = pnand %p555_p4, %p549_p2 }
  0x48   : > { %480 = vpow2.f32 %v238_v12  ;;  %v249_v30 = vsel %vm248_vm2, %v244_v9, %v242_v27 }
  0x49   : > { %482 = vpow2.f32 %v245_v13  ;;  %v256_v34 = vsel %vm255_vm3, %v251_v10, %v249_v30 }
  0x4a   : > { %484 = vpow2.f32 %v252_v14 }
  0x54   : > { %v479_v15 = vpop.eup %478 }
  0x55   : > { %v481_v16 = vpop.eup %480  ;;  %v236_v23 = vsel %vm234_vm0, %v479_v15, 0.0 }
  0x56   : > { %v483_v17 = vpop.eup %482  ;;  %v240_v18 = vadd.f32 %v481_v16, %v479_v15  ;;  %v243_v24 = vsel %vm241_vm1, %v481_v16, %v236_v23 }
  0x57   : > { %v485_v19 = vpop.eup %484  ;;  %v250_v26 = vsel %vm248_vm2, %v483_v17, %v243_v24 }
  0x58   : > { %v247_v20 = vadd.f32 %v483_v17, %v240_v18  ;;  %v257_v28 = vsel %vm255_vm3, %v485_v19, %v250_v26 }
  0x5a   : > { %v254_v22 = vadd.f32 %v485_v19, %v247_v20 }
  0x5c   : > { %486 = vlog2.f32 %v254_v22 }
  0x5d   : > { %488 = vrcp.f32 %v254_v22 }
  0x69   : > { %v487_v29 = vpop.eup %486 }
  0x6a   : > { %v489_v31 = vpop.eup %488  ;;  %v259_v32 = vmul.f32 0.6931472, %v487_v29 }
  0x6b   : > { %v262_v33 = vmul.f32 %v489_v31, %v257_v28 }
  0x6c   : > { %v260_v36 = vsub.f32 %v256_v34, %v259_v32 }
  0x6d   : > { %v263_v35 = vsub.f32 1.0, %v262_v33 }
  0x6f   : > { %v264_v37 = vmul.f32 %v263_v35, %v263_v35 }
  0x71   : > { %v265_v38 = vsub.f32 0.0, %v264_v37 }
  0x73   : > { %v266_v39 = vmul.f32 %v265_v38, %v260_v36 }
  0x75   : > { %267 = vst [vmem:[%s218_s21] sm:$0x3] %v266_v39 }
  0x76   : > { %559 = shalt.err (!%p556_p7)
}
  0x77   : > { %s560_s12 = scalar_lea.hbm %s281_s8, 32  ;;  %s564_s19 = scalar_lea.hbm %s820_s2, 64 }
  0x78   : > { %p561_p1 = scmp.ne.s32.totalorder %s281_s8, %s560_s12  ;;  %p565_p3 = scmp.lt.s32.totalorder %s281_s8, %s820_s2 }
  0x79   : > { %p566_p8 = scmp.lt.s32.totalorder %s564_s19, %s560_s12 }
  0x7a   : > { %p562_p10 = pnand %p561_p1, %p703_p9 }
  0x7b   : > { %p567_p0 = por %p566_p8, %p565_p3 }
  0x7c   : > { %p563_p13 = pneg %p562_p10 }
  0x7e   : > { %p568_p12 = pnand %p567_p0, %p563_p13 }
  0x80   : > { %571 = shalt.err (!%p568_p12)
}
  0x81   : > { %413 = dma.vmem_to_hbm [thread:$0]  (%p703_p9), %s284_s28, 32, %s281_s8, %s269_s15  }
  0x82 PF: > { %s295_s26 = sand.u32 1, %s610_s9   ;;  %p827_p2 = scmp.ge.s32.totalorder %s630_s14, 2 }
  0x83   : > { %s296_s27 = scalar_lea.sflag [#allocation4], %s295_s26 }
  0x84   : > { %p423_p5 = pnand %p827_p2, %p710_p11 }
  0x86   : > { %p424_p6 = pneg %p423_p5 }
  0x88   : > { %605 = dma.done.wait (%p424_p6), %s296_s27, 32  }
  0x89   : > { %607 = vsyncadd (%p424_p6), %s296_s27, 4294967264  ;;  %s21_s14 = sadd.s32 1, %s630_s14   ;;  %s828_s9 = smov %s614_s10 }
  0x8a   : > { %p18_p4 = scmp.ge.s32.totalorder %s21_s14, 4   ;;  %s829_s10 = smov %s618_s11 }
  0x8b   : > { %s830_s11 = smov %s708_s23  ;;  %s831_s12 = smov %s626_s13 }
  0x8c   : > { %s832_s13 = smov %s834_s17  ;;  %20 = sbr.rel (!%p18_p4) target bundleno = 8 (0x8), region = 89 }
  0x91   :  { %301 = vsyncpa [#allocation3], 1 }
  0x92   :  { %303 = vsyncpa [#allocation3 + $0x1], 1 }
  0x93   :  { %304 = vsyncpa [#allocation6], 1 }
  0x94   :  { %306 = vsyncpa [#allocation6 + $0x1], 1 }
  0x95   :  { %307 = vsyncpa [#allocation4], 1 }
  0x96   :  { %309 = vsyncpa [#allocation4 + $0x1], 1 }

</bundles_post_ra>
